<compile_context>
chip_gen: v7x
topology: tpu7x:2x2x1
jax: 0.10.0
libtpu: 0.0.40
codegen_flags: <defaults>
</compile_context>

<pallas_src>
import re

import jax
import jax.numpy as jnp
from jax.experimental import pallas as pl
from jax.experimental.pallas import tpu as pltpu

_LANE = 128
_SUB = 32                       # sublane multiple legal for f32/bf16/int8 tiles
_CAND_COLS = (4096, 2048, 1024, 512, 256, 128)
_SMALL_BYTES = 512 * 1024       # below this, plain fused XLA already hits roofline


def _tpu_generation() -> int:
    try:
        kind = jax.devices()[0].device_kind
    except Exception:
        return 0
    m = re.search(r"(\d+)", kind)
    return int(m.group(1)) if m else 0


def _block_policy():
    """Returns (per-operand block bytes, vmem_limit_bytes) per TPU generation."""
    gen = _tpu_generation()
    if gen >= 6:
        # v6e (~1.4 TB/s) / v7x (~3.2 TB/s): bigger blocks amortise the
        # ~0.35 us/step pipeline overhead. 2 operands x 2 buffers x 6 MiB =
        # 24 MiB; request 40 MiB scoped VMEM for headroom (v7x physical 64 MiB).
        return 6 * 1024 * 1024, 40 * 1024 * 1024
    # v5e / older / unknown: 2 MiB blocks (8 MiB total with double buffering)
    # stay comfortably under the 16 MiB scoped-VMEM default; per-step overhead
    # is already <8% at ~0.82 TB/s.
    return 2 * 1024 * 1024, None


def _scale_kernel(w_ref, x_ref, o_ref):
    # Pure VPU elementwise scale; the weight scalar lives in SMEM so distinct
    # (or traced) weight values do not create new Mosaic executables.
    o_ref[...] = (x_ref[...] * w_ref[0]).astype(o_ref.dtype)


def _scale_2d(x2d, weight, *, block_bytes, vmem_limit):
    """weight * x2d for a (rows, cols) array via a row/col-blocked Pallas kernel."""
    rows, cols = x2d.shape
    itemsize = jnp.dtype(x2d.dtype).itemsize

    # Column blocking: keep full rows (one contiguous DMA per block) whenever a
    # _SUB-row slab fits the budget; otherwise use 128-multiple column chunks.
    if cols * itemsize * _SUB <= block_bytes or cols <= _LANE:
        block_cols = cols
    else:
        block_cols = max(_LANE, (block_bytes // (_SUB * itemsize)) // _LANE * _LANE)
        block_cols = min(block_cols, cols)

    # Row blocking to ~block_bytes per operand block (multiple of 32 sublanes,
    # legal for f32 / bf16 / int8 native tiles). Full-extent blocks are exempt.
    max_rows = max(_SUB, (block_bytes // (block_cols * itemsize)) // _SUB * _SUB)
    block_rows = rows if rows <= max_rows else max_rows

    grid = (pl.cdiv(rows, block_rows), pl.cdiv(cols, block_cols))
    w_arr = jnp.asarray(weight, dtype=jnp.float32).reshape((1,))

    return pl.pallas_call(
        _scale_kernel,
        out_shape=jax.ShapeDtypeStruct((rows, cols), x2d.dtype),
        grid=grid,
        in_specs=[
            pl.BlockSpec(memory_space=pltpu.MemorySpace.SMEM),   # weight scalar
            pl.BlockSpec((block_rows, block_cols), lambda i, j: (i, j)),
        ],
        out_specs=pl.BlockSpec((block_rows, block_cols), lambda i, j: (i, j)),
        compiler_params=pltpu.CompilerParams(
            # "parallel" lets the runtime shard independent blocks across
            # TensorCores where megacore sharding applies.
            # TODO(synk): on v7x, verify row-blocks actually split across both
            # TCs; switch to pltpu.CORE_PARALLEL if a trace shows one idle TC.
            dimension_semantics=("parallel", "parallel"),
            vmem_limit_bytes=vmem_limit,
        ),
    )(w_arr, x2d)


def _scale_flat_128(flat, weight, *, block_bytes, vmem_limit):
    """weight * flat for a 1-D array whose length is a multiple of 128."""
    n = flat.shape[0]
    cols = next(c for c in _CAND_COLS if n % c == 0)   # 128 always divides n here
    out2d = _scale_2d(flat.reshape(-1, cols), weight,
                      block_bytes=block_bytes, vmem_limit=vmem_limit)
    return out2d.reshape(-1)


class RegularizationResiduals:
    """JAX/Pallas port of the PyTorch RegularizationResiduals module."""

    def __init__(self, name: str, weight: float = 1.0):
        self.name = name
        self.weight = weight

    @property
    def names(self):
        return [self.name]

    def forward(self, **kwargs):
        params = kwargs["params"][self.name]
        if params is None:
            # Matches torch.tensor([], device=...).
            return [jnp.zeros((0,), dtype=jnp.float32)]

        params = jnp.asarray(params)
        n = params.size
        itemsize = jnp.dtype(params.dtype).itemsize

        # Small-tensor fast path: custom-call launch overhead and lost fusion
        # with the surrounding reshape/concatenate dominate below ~512 KiB.
        if n * itemsize < _SMALL_BYTES:
            return [(self.weight * params.reshape(-1)).astype(params.dtype)]

        block_bytes, vmem_limit = _block_policy()

        # Native-2D path: minor dim already lane-dense (multiple of 128) ->
        # collapse leading dims only (layout-preserving) and skip the
        # flatten->reshape relayout round-trip.
        if params.ndim >= 2 and params.shape[-1] % _LANE == 0:
            x2d = params.reshape(-1, params.shape[-1])
            out2d = _scale_2d(x2d, self.weight,
                              block_bytes=block_bytes, vmem_limit=vmem_limit)
            return [out2d.reshape(-1)]

        flat = params.reshape(-1)   # same row-major order as torch .view(-1)
        if n % _LANE == 0:
            return [_scale_flat_128(flat, self.weight,
                                    block_bytes=block_bytes,
                                    vmem_limit=vmem_limit)]

        # Awkward size: kernel on the 128-aligned prefix, plain jnp on the
        # (<128-element) tail. No full-tensor pad / trailing-slice round-trips.
        n_aligned = (n // _LANE) * _LANE
        head = _scale_flat_128(flat[:n_aligned], self.weight,
                               block_bytes=block_bytes, vmem_limit=vmem_limit)
        tail = (self.weight * flat[n_aligned:]).astype(params.dtype)
        return [jnp.concatenate([head, tail])]

    def step(self, **kwargs):
        residuals = self.forward(**kwargs)
        F = jnp.concatenate(residuals)
        info = {n: r for n, r in zip(self.names, residuals)}
        return F.reshape(-1), info


if __name__ == "__main__":
    key = jax.random.PRNGKey(0)
    module = RegularizationResiduals(name="reg_param", weight=0.5)

    # 1) Small NCHW conv-weight shape -> plain-XLA fast path.
    x_small = jax.random.normal(key, (2, 4, 16, 16), dtype=jnp.float32)
    F, info = module.step(params={"reg_param": x_small}, s_point=x_small)
    F = jax.block_until_ready(F)
    ref = 0.5 * x_small.reshape(-1)
    assert F.shape == ref.shape, (F.shape, ref.shape)
    assert jnp.allclose(F, ref, atol=1e-6), "mismatch (small fast path)"
    assert jnp.allclose(info["reg_param"], ref, atol=1e-6)

    # 2) Weight-matrix shape with lane-dense minor dim -> native-2D Pallas path.
    x_mat = jax.random.normal(jax.random.PRNGKey(1), (512, 512), dtype=jnp.float32)
    F2, _ = module.step(params={"reg_param": x_mat}, s_point=x_mat)
    F2 = jax.block_until_ready(F2)
    assert jnp.allclose(F2, 0.5 * x_mat.reshape(-1), atol=1e-6), "mismatch (2D path)"

    # 3) Conv-style shape: minor dim not lane-dense, total divisible by 4096
    #    -> flatten + lane-dense reshape Pallas path.
    x_conv = jax.random.normal(jax.random.PRNGKey(2), (512, 16, 64), dtype=jnp.float32)
    F3, _ = module.step(params={"reg_param": x_conv}, s_point=x_conv)
    F3 = jax.block_until_ready(F3)
    assert jnp.allclose(F3, 0.5 * x_conv.reshape(-1), atol=1e-6), "mismatch (flatten path)"

    # 4) Awkward (non-multiple-of-128) size -> prefix kernel + jnp tail path.
    x_rag = jax.random.normal(jax.random.PRNGKey(3), (3, 209, 210), dtype=jnp.float32)
    F4, _ = module.step(params={"reg_param": x_rag}, s_point=x_rag)
    F4 = jax.block_until_ready(F4)
    ref4 = 0.5 * x_rag.reshape(-1)
    assert F4.shape == ref4.shape, (F4.shape, ref4.shape)
    assert jnp.allclose(F4, ref4, atol=1e-6), "mismatch (ragged path)"

    # 5) None branch (empty residual).
    F_empty, _ = module.step(params={"reg_param": None}, s_point=x_small)
    jax.block_until_ready(F_empty)
    assert F_empty.shape == (0,)

    print("KERNEL_OK")
</pallas_src>

<mosaic_0001>
module attributes {stable_mosaic.version = 11 : i64} {
  func.func @_scale_kernel(%arg0: i32, %arg1: i32, %arg2: memref<1xf32, #tpu.memory_space<smem>>, %arg3: memref<512x512xf32, #tpu.memory_space<vmem>>, %arg4: memref<512x512xf32, #tpu.memory_space<vmem>>) attributes {dimension_semantics = [#tpu.dimension_semantics<parallel>, #tpu.dimension_semantics<parallel>], iteration_bounds = array<i64: 1, 1>, scalar_prefetch = 0 : i64, scratch_operands = 0 : i64, tpu.core_type = #tpu.core_type<tc>, window_params = [{transform_indices = @transform_0, window_bounds = array<i64: 1>}, {transform_indices = @transform_1, window_bounds = array<i64: 512, 512>}, {transform_indices = @transform_2, window_bounds = array<i64: 512, 512>}]} {
    %c0 = arith.constant 0 : index
    %c0_0 = arith.constant 0 : index
    %0 = vector.load %arg3[%c0, %c0_0] : memref<512x512xf32, #tpu.memory_space<vmem>>, vector<512x512xf32>
    %c0_1 = arith.constant 0 : index
    %1 = memref.load %arg2[%c0_1] : memref<1xf32, #tpu.memory_space<smem>>
    %2 = vector.broadcast %1 : f32 to vector<512x512xf32>
    %3 = arith.mulf %0, %2 : vector<512x512xf32>
    %c0_2 = arith.constant 0 : index
    %c0_3 = arith.constant 0 : index
    %4 = vector.load %arg4[%c0_2, %c0_3] : memref<512x512xf32, #tpu.memory_space<vmem>>, vector<512x512xf32>
    tpu.vector_store %arg4[%c0_2, %c0_3], %3 {strides = array<i32>} : memref<512x512xf32, #tpu.memory_space<vmem>>, vector<512x512xf32>,
    return
  }
  func.func @transform_0(%arg0: i32, %arg1: i32) -> i32 {
    %c0_i32 = arith.constant 0 : i32
    %c0_i32_0 = arith.constant 0 : i32
    return %c0_i32 : i32
  }
  func.func @transform_1(%arg0: i32, %arg1: i32) -> (i32, i32) {
    %c0_i32 = arith.constant 0 : i32
    return %arg0, %arg1 : i32, i32
  }
  func.func @transform_2(%arg0: i32, %arg1: i32) -> (i32, i32) {
    %c0_i32 = arith.constant 0 : i32
    return %arg0, %arg1 : i32, i32
  }
}

</mosaic_0001>

<bundles_post_ra>
// kernel: tpu_custom_call.1
= control target key start
LH: loop header
LB: loop body
LE: loop exit
PB: predicated region body
PF: predicated region fallthrough
CT: control target
= control target key end

     0   :  { %8 = vsyncpa [#allocation4], 0  ;;  %s1176_s0 = inlined_call_operand.<no memory space> [shape: f32[1], index: 0, kind: input, shape index: {}]   ;;  %s1177_s1 = inlined_call_operand.hbm [shape: f32[512,512], index: 1, kind: input, shape index: {}]   ;;  %s1178_s2 = inlined_call_operand.hbm [shape: f32[512,512], index: 2, kind: output, shape index: {}]  }
   0x1   :  { %9 = vsyncpa [#allocation5], 0  ;;  %s866_s9 = smov [#allocation3]   ;;  %s818_s13 = scalar_lea.hbm %s1177_s1, 32768 }
   0x2   :  { %s17_s10 = sshll.u32 %s866_s9, 4  ;;  %p819_p0 = scmp.ne.s32.totalorder %s1177_s1, %s818_s13  ;;  %s18_s10 = int_to_ptr.vmem [resolvable:$true] %s17_s10 }
   0x3   :  { %p822_p1 = scmp.lt.u32.totalorder %s818_s13, %s1177_s1 }
   0x5   :  { %p824_p2 = pnand %p822_p1, %p819_p0 }
   0x7   :  { %827 = shalt.err (!%p824_p2)
}
   0x8   :  { %s828_s18 = scalar_lea.vmem %s18_s10, 32768  ;;  %p833_p4 = scmp.lt.s32.totalorder %s18_s10, %s18_s10 }
   0x9   :  { %p829_p3 = scmp.ne.s32.totalorder %s18_s10, %s828_s18  ;;  %p834_p5 = scmp.lt.s32.totalorder %s828_s18, %s828_s18 }
   0xb   :  { %p835_p6 = por %p834_p5, %p833_p4 }
   0xd   :  { %p836_p7 = pnand %p835_p6, %p829_p3 }
   0xf   :  { %839 = shalt.err (!%p836_p7)
}
  0x10   :  { %s867_s19 = smov 512   ;;  %s868_s20 = smov 32  }
  0x11   :  { %23 = dma.hbm_to_vmem [thread:$0]  %s1177_s1, 32768, %s18_s10, [#allocation4], %s867_s19, %s867_s19, %s868_s20  }
  0x12   :  { %862 = dma.done.wait [#allocation4], 32768  }
  0x13   :  { %863 = vsyncadd [#allocation4], 4294934528  ;;  %v903_v0 = vstv %s1176_s0  ;;  %v27_v1 = vld [vmem:[#allocation3] sm:$0xff]  ;;  %v28_v2 = vld [vmem:[#allocation3 + $0x8] sm:$0xff]  ;;  %s869_s0 = smov [#allocation6]  }
  0x14   :  { %v29_v3 = vld [vmem:[#allocation3 + $0x10] sm:$0xff]  ;;  %v285_v4 = vmul.f32 %v903_v0, %v27_v1  ;;  %v286_v5 = vmul.f32 %v903_v0, %v28_v2  ;;  %v30_v7 = vld [vmem:[#allocation3 + $0x18] sm:$0xff]  ;;  %v31_v8 = vld [vmem:[#allocation3 + $0x20] sm:$0xff]  ;;  %s802_s1 = sshll.u32 %s869_s0, 4  ;;  %s803_s1 = int_to_ptr.vmem [resolvable:$true] %s802_s1 }
  0x15   :  { %v287_v6 = vmul.f32 %v903_v0, %v29_v3  ;;  %v32_v9 = vld [vmem:[#allocation3 + $0x28] sm:$0xff]  ;;  %v288_v10 = vmul.f32 %v903_v0, %v30_v7  ;;  %v289_v11 = vmul.f32 %v903_v0, %v31_v8  ;;  %v33_v13 = vld [vmem:[#allocation3 + $0x30] sm:$0xff]  ;;  %v34_v14 = vld [vmem:[#allocation3 + $0x38] sm:$0xff]  ;;  %s840_s25 = scalar_lea.vmem %s803_s1, 32768  ;;  %p845_p9 = scmp.lt.s32.totalorder %s803_s1, %s803_s1 }
  0x16   :  { %v290_v12 = vmul.f32 %v903_v0, %v32_v9  ;;  %v35_v15 = vld [vmem:[#allocation3 + $0x40] sm:$0xff]  ;;  %541 = vst [vmem:[#allocation6] sm:$0xff] %v285_v4  ;;  %542 = vst [vmem:[#allocation6 + $0x8] sm:$0xff] %v286_v5  ;;  %v291_v16 = vmul.f32 %v903_v0, %v33_v13  ;;  %v292_v17 = vmul.f32 %v903_v0, %v34_v14  ;;  %v36_v19 = vld [vmem:[#allocation3 + $0x48] sm:$0xff]  ;;  %p841_p8 = scmp.ne.s32.totalorder %s803_s1, %s840_s25  ;;  %p846_p10 = scmp.lt.s32.totalorder %s840_s25, %s840_s25 }
  0x17   :  { %543 = vst [vmem:[#allocation6 + $0x10] sm:$0xff] %v287_v6  ;;  %v293_v18 = vmul.f32 %v903_v0, %v35_v15  ;;  %v37_v20 = vld [vmem:[#allocation3 + $0x50] sm:$0xff]  ;;  %v38_v21 = vld [vmem:[#allocation3 + $0x58] sm:$0xff]  ;;  %544 = vst [vmem:[#allocation6 + $0x18] sm:$0xff] %v288_v10  ;;  %v294_v22 = vmul.f32 %v903_v0, %v36_v19 }
  0x18   :  { %545 = vst [vmem:[#allocation6 + $0x20] sm:$0xff] %v289_v11  ;;  %546 = vst [vmem:[#allocation6 + $0x28] sm:$0xff] %v290_v12  ;;  %v295_v23 = vmul.f32 %v903_v0, %v37_v20  ;;  %v296_v24 = vmul.f32 %v903_v0, %v38_v21  ;;  %v39_v25 = vld [vmem:[#allocation3 + $0x60] sm:$0xff]  ;;  %v40_v26 = vld [vmem:[#allocation3 + $0x68] sm:$0xff]  ;;  %p847_p11 = por %p846_p10, %p845_p9 }
  0x19   :  { %v41_v27 = vld [vmem:[#allocation3 + $0x70] sm:$0xff]  ;;  %547 = vst [vmem:[#allocation6 + $0x30] sm:$0xff] %v291_v16  ;;  %548 = vst [vmem:[#allocation6 + $0x38] sm:$0xff] %v292_v17  ;;  %v297_v28 = vmul.f32 %v903_v0, %v39_v25  ;;  %v298_v29 = vmul.f32 %v903_v0, %v40_v26  ;;  %v42_v31 = vld [vmem:[#allocation3 + $0x78] sm:$0xff] }
  0x1a   :  { %549 = vst [vmem:[#allocation6 + $0x40] sm:$0xff] %v293_v18  ;;  %v299_v30 = vmul.f32 %v903_v0, %v41_v27  ;;  %v43_v32 = vld [vmem:[#allocation3 + $0x80] sm:$0xff]  ;;  %v44_v33 = vld [vmem:[#allocation3 + $0x88] sm:$0xff]  ;;  %550 = vst [vmem:[#allocation6 + $0x48] sm:$0xff] %v294_v22  ;;  %v300_v34 = vmul.f32 %v903_v0, %v42_v31  ;;  %p848_p12 = pnand %p847_p11, %p841_p8 }
  0x1b   :  { %551 = vst [vmem:[#allocation6 + $0x50] sm:$0xff] %v295_v23  ;;  %552 = vst [vmem:[#allocation6 + $0x58] sm:$0xff] %v296_v24  ;;  %v301_v35 = vmul.f32 %v903_v0, %v43_v32  ;;  %v302_v36 = vmul.f32 %v903_v0, %v44_v33  ;;  %v45_v37 = vld [vmem:[#allocation3 + $0x90] sm:$0xff]  ;;  %v46_v38 = vld [vmem:[#allocation3 + $0x98] sm:$0xff] }
  0x1c   :  { %v47_v39 = vld [vmem:[#allocation3 + $0xa0] sm:$0xff]  ;;  %553 = vst [vmem:[#allocation6 + $0x60] sm:$0xff] %v297_v28  ;;  %554 = vst [vmem:[#allocation6 + $0x68] sm:$0xff] %v298_v29  ;;  %v303_v40 = vmul.f32 %v903_v0, %v45_v37  ;;  %v304_v41 = vmul.f32 %v903_v0, %v46_v38  ;;  %v48_v43 = vld [vmem:[#allocation3 + $0xa8] sm:$0xff] }
  0x1d   :  { %555 = vst [vmem:[#allocation6 + $0x70] sm:$0xff] %v299_v30  ;;  %v305_v42 = vmul.f32 %v903_v0, %v47_v39  ;;  %v49_v44 = vld [vmem:[#allocation3 + $0xb0] sm:$0xff]  ;;  %v50_v45 = vld [vmem:[#allocation3 + $0xb8] sm:$0xff]  ;;  %556 = vst [vmem:[#allocation6 + $0x78] sm:$0xff] %v300_v34  ;;  %v306_v46 = vmul.f32 %v903_v0, %v48_v43 }
  0x1e   :  { %557 = vst [vmem:[#allocation6 + $0x80] sm:$0xff] %v301_v35  ;;  %558 = vst [vmem:[#allocation6 + $0x88] sm:$0xff] %v302_v36  ;;  %v307_v47 = vmul.f32 %v903_v0, %v49_v44  ;;  %v308_v48 = vmul.f32 %v903_v0, %v50_v45  ;;  %v51_v49 = vld [vmem:[#allocation3 + $0xc0] sm:$0xff]  ;;  %v52_v50 = vld [vmem:[#allocation3 + $0xc8] sm:$0xff] }
  0x1f   :  { %v53_v51 = vld [vmem:[#allocation3 + $0xd0] sm:$0xff]  ;;  %559 = vst [vmem:[#allocation6 + $0x90] sm:$0xff] %v303_v40  ;;  %560 = vst [vmem:[#allocation6 + $0x98] sm:$0xff] %v304_v41  ;;  %v309_v52 = vmul.f32 %v903_v0, %v51_v49  ;;  %v310_v53 = vmul.f32 %v903_v0, %v52_v50  ;;  %v54_v55 = vld [vmem:[#allocation3 + $0xd8] sm:$0xff] }
  0x20   :  { %561 = vst [vmem:[#allocation6 + $0xa0] sm:$0xff] %v305_v42  ;;  %v311_v54 = vmul.f32 %v903_v0, %v53_v51  ;;  %v55_v56 = vld [vmem:[#allocation3 + $0xe0] sm:$0xff]  ;;  %v56_v57 = vld [vmem:[#allocation3 + $0xe8] sm:$0xff]  ;;  %562 = vst [vmem:[#allocation6 + $0xa8] sm:$0xff] %v306_v46  ;;  %v312_v58 = vmul.f32 %v903_v0, %v54_v55 }
  0x21   :  { %563 = vst [vmem:[#allocation6 + $0xb0] sm:$0xff] %v307_v47  ;;  %564 = vst [vmem:[#allocation6 + $0xb8] sm:$0xff] %v308_v48  ;;  %v313_v59 = vmul.f32 %v903_v0, %v55_v56  ;;  %v314_v60 = vmul.f32 %v903_v0, %v56_v57  ;;  %v57_v61 = vld [vmem:[#allocation3 + $0xf0] sm:$0xff]  ;;  %v58_v62 = vld [vmem:[#allocation3 + $0xf8] sm:$0xff] }
  0x22   :  { %v59_v63 = vld [vmem:[#allocation3 + $0x100] sm:$0xff]  ;;  %565 = vst [vmem:[#allocation6 + $0xc0] sm:$0xff] %v309_v52  ;;  %566 = vst [vmem:[#allocation6 + $0xc8] sm:$0xff] %v310_v53  ;;  %v315_v1 = vmul.f32 %v903_v0, %v57_v61  ;;  %v316_v2 = vmul.f32 %v903_v0, %v58_v62  ;;  %v60_v4 = vld [vmem:[#allocation3 + $0x108] sm:$0xff] }
  0x23   :  { %567 = vst [vmem:[#allocation6 + $0xd0] sm:$0xff] %v311_v54  ;;  %v317_v3 = vmul.f32 %v903_v0, %v59_v63  ;;  %v61_v5 = vld [vmem:[#allocation3 + $0x110] sm:$0xff]  ;;  %v62_v6 = vld [vmem:[#allocation3 + $0x118] sm:$0xff]  ;;  %568 = vst [vmem:[#allocation6 + $0xd8] sm:$0xff] %v312_v58  ;;  %v318_v7 = vmul.f32 %v903_v0, %v60_v4 }
  0x24   :  { %569 = vst [vmem:[#allocation6 + $0xe0] sm:$0xff] %v313_v59  ;;  %570 = vst [vmem:[#allocation6 + $0xe8] sm:$0xff] %v314_v60  ;;  %v319_v8 = vmul.f32 %v903_v0, %v61_v5  ;;  %v320_v9 = vmul.f32 %v903_v0, %v62_v6  ;;  %v63_v10 = vld [vmem:[#allocation3 + $0x120] sm:$0xff]  ;;  %v64_v11 = vld [vmem:[#allocation3 + $0x128] sm:$0xff] }
  0x25   :  { %v65_v12 = vld [vmem:[#allocation3 + $0x130] sm:$0xff]  ;;  %571 = vst [vmem:[#allocation6 + $0xf0] sm:$0xff] %v315_v1  ;;  %572 = vst [vmem:[#allocation6 + $0xf8] sm:$0xff] %v316_v2  ;;  %v321_v13 = vmul.f32 %v903_v0, %v63_v10  ;;  %v322_v14 = vmul.f32 %v903_v0, %v64_v11  ;;  %v66_v16 = vld [vmem:[#allocation3 + $0x138] sm:$0xff] }
  0x26   :  { %573 = vst [vmem:[#allocation6 + $0x100] sm:$0xff] %v317_v3  ;;  %v323_v15 = vmul.f32 %v903_v0, %v65_v12  ;;  %v67_v17 = vld [vmem:[#allocation3 + $0x140] sm:$0xff]  ;;  %v68_v18 = vld [vmem:[#allocation3 + $0x148] sm:$0xff]  ;;  %574 = vst [vmem:[#allocation6 + $0x108] sm:$0xff] %v318_v7  ;;  %v324_v19 = vmul.f32 %v903_v0, %v66_v16 }
  0x27   :  { %575 = vst [vmem:[#allocation6 + $0x110] sm:$0xff] %v319_v8  ;;  %576 = vst [vmem:[#allocation6 + $0x118] sm:$0xff] %v320_v9  ;;  %v325_v20 = vmul.f32 %v903_v0, %v67_v17  ;;  %v326_v21 = vmul.f32 %v903_v0, %v68_v18  ;;  %v69_v22 = vld [vmem:[#allocation3 + $0x150] sm:$0xff]  ;;  %v70_v23 = vld [vmem:[#allocation3 + $0x158] sm:$0xff] }
  0x28   :  { %v71_v24 = vld [vmem:[#allocation3 + $0x160] sm:$0xff]  ;;  %577 = vst [vmem:[#allocation6 + $0x120] sm:$0xff] %v321_v13  ;;  %578 = vst [vmem:[#allocation6 + $0x128] sm:$0xff] %v322_v14  ;;  %v327_v25 = vmul.f32 %v903_v0, %v69_v22  ;;  %v328_v26 = vmul.f32 %v903_v0, %v70_v23  ;;  %v72_v28 = vld [vmem:[#allocation3 + $0x168] sm:$0xff] }
  0x29   :  { %579 = vst [vmem:[#allocation6 + $0x130] sm:$0xff] %v323_v15  ;;  %v329_v27 = vmul.f32 %v903_v0, %v71_v24  ;;  %v73_v29 = vld [vmem:[#allocation3 + $0x170] sm:$0xff]  ;;  %v74_v30 = vld [vmem:[#allocation3 + $0x178] sm:$0xff]  ;;  %580 = vst [vmem:[#allocation6 + $0x138] sm:$0xff] %v324_v19  ;;  %v330_v31 = vmul.f32 %v903_v0, %v72_v28 }
  0x2a   :  { %581 = vst [vmem:[#allocation6 + $0x140] sm:$0xff] %v325_v20  ;;  %582 = vst [vmem:[#allocation6 + $0x148] sm:$0xff] %v326_v21  ;;  %v331_v32 = vmul.f32 %v903_v0, %v73_v29  ;;  %v332_v33 = vmul.f32 %v903_v0, %v74_v30  ;;  %v75_v34 = vld [vmem:[#allocation3 + $0x180] sm:$0xff]  ;;  %v76_v35 = vld [vmem:[#allocation3 + $0x188] sm:$0xff] }
  0x2b   :  { %v77_v36 = vld [vmem:[#allocation3 + $0x190] sm:$0xff]  ;;  %583 = vst [vmem:[#allocation6 + $0x150] sm:$0xff] %v327_v25  ;;  %584 = vst [vmem:[#allocation6 + $0x158] sm:$0xff] %v328_v26  ;;  %v333_v37 = vmul.f32 %v903_v0, %v75_v34  ;;  %v334_v38 = vmul.f32 %v903_v0, %v76_v35  ;;  %v78_v40 = vld [vmem:[#allocation3 + $0x198] sm:$0xff] }
  0x2c   :  { %585 = vst [vmem:[#allocation6 + $0x160] sm:$0xff] %v329_v27  ;;  %v335_v39 = vmul.f32 %v903_v0, %v77_v36  ;;  %v79_v41 = vld [vmem:[#allocation3 + $0x1a0] sm:$0xff]  ;;  %v80_v42 = vld [vmem:[#allocation3 + $0x1a8] sm:$0xff]  ;;  %586 = vst [vmem:[#allocation6 + $0x168] sm:$0xff] %v330_v31  ;;  %v336_v43 = vmul.f32 %v903_v0, %v78_v40 }
  0x2d   :  { %587 = vst [vmem:[#allocation6 + $0x170] sm:$0xff] %v331_v32  ;;  %588 = vst [vmem:[#allocation6 + $0x178] sm:$0xff] %v332_v33  ;;  %v337_v44 = vmul.f32 %v903_v0, %v79_v41  ;;  %v338_v45 = vmul.f32 %v903_v0, %v80_v42  ;;  %v81_v46 = vld [vmem:[#allocation3 + $0x1b0] sm:$0xff]  ;;  %v82_v47 = vld [vmem:[#allocation3 + $0x1b8] sm:$0xff] }
  0x2e   :  { %v83_v48 = vld [vmem:[#allocation3 + $0x1c0] sm:$0xff]  ;;  %589 = vst [vmem:[#allocation6 + $0x180] sm:$0xff] %v333_v37  ;;  %590 = vst [vmem:[#allocation6 + $0x188] sm:$0xff] %v334_v38  ;;  %v339_v49 = vmul.f32 %v903_v0, %v81_v46  ;;  %v340_v50 = vmul.f32 %v903_v0, %v82_v47  ;;  %v84_v52 = vld [vmem:[#allocation3 + $0x1c8] sm:$0xff] }
  0x2f   :  { %591 = vst [vmem:[#allocation6 + $0x190] sm:$0xff] %v335_v39  ;;  %v341_v51 = vmul.f32 %v903_v0, %v83_v48  ;;  %v85_v53 = vld [vmem:[#allocation3 + $0x1d0] sm:$0xff]  ;;  %v86_v54 = vld [vmem:[#allocation3 + $0x1d8] sm:$0xff]  ;;  %592 = vst [vmem:[#allocation6 + $0x198] sm:$0xff] %v336_v43  ;;  %v342_v55 = vmul.f32 %v903_v0, %v84_v52 }
  0x30   :  { %593 = vst [vmem:[#allocation6 + $0x1a0] sm:$0xff] %v337_v44  ;;  %594 = vst [vmem:[#allocation6 + $0x1a8] sm:$0xff] %v338_v45  ;;  %v343_v56 = vmul.f32 %v903_v0, %v85_v53  ;;  %v344_v57 = vmul.f32 %v903_v0, %v86_v54  ;;  %v87_v58 = vld [vmem:[#allocation3 + $0x1e0] sm:$0xff]  ;;  %v88_v59 = vld [vmem:[#allocation3 + $0x1e8] sm:$0xff] }
  0x31   :  { %v89_v60 = vld [vmem:[#allocation3 + $0x1f0] sm:$0xff]  ;;  %595 = vst [vmem:[#allocation6 + $0x1b0] sm:$0xff] %v339_v49  ;;  %596 = vst [vmem:[#allocation6 + $0x1b8] sm:$0xff] %v340_v50  ;;  %v345_v61 = vmul.f32 %v903_v0, %v87_v58  ;;  %v346_v62 = vmul.f32 %v903_v0, %v88_v59  ;;  %v90_v1 = vld [vmem:[#allocation3 + $0x1f8] sm:$0xff] }
  0x32   :  { %597 = vst [vmem:[#allocation6 + $0x1c0] sm:$0xff] %v341_v51  ;;  %v347_v63 = vmul.f32 %v903_v0, %v89_v60  ;;  %v91_v2 = vld [vmem:[#allocation3 + $0x200] sm:$0xff]  ;;  %v92_v3 = vld [vmem:[#allocation3 + $0x208] sm:$0xff]  ;;  %598 = vst [vmem:[#allocation6 + $0x1c8] sm:$0xff] %v342_v55  ;;  %v348_v4 = vmul.f32 %v903_v0, %v90_v1 }
  0x33   :  { %599 = vst [vmem:[#allocation6 + $0x1d0] sm:$0xff] %v343_v56  ;;  %600 = vst [vmem:[#allocation6 + $0x1d8] sm:$0xff] %v344_v57  ;;  %v349_v5 = vmul.f32 %v903_v0, %v91_v2  ;;  %v350_v6 = vmul.f32 %v903_v0, %v92_v3  ;;  %v93_v7 = vld [vmem:[#allocation3 + $0x210] sm:$0xff]  ;;  %v94_v8 = vld [vmem:[#allocation3 + $0x218] sm:$0xff] }
  0x34   :  { %v95_v9 = vld [vmem:[#allocation3 + $0x220] sm:$0xff]  ;;  %601 = vst [vmem:[#allocation6 + $0x1e0] sm:$0xff] %v345_v61  ;;  %602 = vst [vmem:[#allocation6 + $0x1e8] sm:$0xff] %v346_v62  ;;  %v351_v10 = vmul.f32 %v903_v0, %v93_v7  ;;  %v352_v11 = vmul.f32 %v903_v0, %v94_v8  ;;  %v96_v13 = vld [vmem:[#allocation3 + $0x228] sm:$0xff] }
  0x35   :  { %603 = vst [vmem:[#allocation6 + $0x1f0] sm:$0xff] %v347_v63  ;;  %v353_v12 = vmul.f32 %v903_v0, %v95_v9  ;;  %v97_v14 = vld [vmem:[#allocation3 + $0x230] sm:$0xff]  ;;  %v98_v15 = vld [vmem:[#allocation3 + $0x238] sm:$0xff]  ;;  %604 = vst [vmem:[#allocation6 + $0x1f8] sm:$0xff] %v348_v4  ;;  %v354_v16 = vmul.f32 %v903_v0, %v96_v13 }
  0x36   :  { %605 = vst [vmem:[#allocation6 + $0x200] sm:$0xff] %v349_v5  ;;  %606 = vst [vmem:[#allocation6 + $0x208] sm:$0xff] %v350_v6  ;;  %v355_v17 = vmul.f32 %v903_v0, %v97_v14  ;;  %v356_v18 = vmul.f32 %v903_v0, %v98_v15  ;;  %v99_v19 = vld [vmem:[#allocation3 + $0x240] sm:$0xff]  ;;  %v100_v20 = vld [vmem:[#allocation3 + $0x248] sm:$0xff] }
  0x37   :  { %v101_v21 = vld [vmem:[#allocation3 + $0x250] sm:$0xff]  ;;  %607 = vst [vmem:[#allocation6 + $0x210] sm:$0xff] %v351_v10  ;;  %608 = vst [vmem:[#allocation6 + $0x218] sm:$0xff] %v352_v11  ;;  %v357_v22 = vmul.f32 %v903_v0, %v99_v19  ;;  %v358_v23 = vmul.f32 %v903_v0, %v100_v20  ;;  %v102_v25 = vld [vmem:[#allocation3 + $0x258] sm:$0xff] }
  0x38   :  { %609 = vst [vmem:[#allocation6 + $0x220] sm:$0xff] %v353_v12  ;;  %v359_v24 = vmul.f32 %v903_v0, %v101_v21  ;;  %v103_v26 = vld [vmem:[#allocation3 + $0x260] sm:$0xff]  ;;  %v104_v27 = vld [vmem:[#allocation3 + $0x268] sm:$0xff]  ;;  %610 = vst [vmem:[#allocation6 + $0x228] sm:$0xff] %v354_v16  ;;  %v360_v28 = vmul.f32 %v903_v0, %v102_v25 }
  0x39   :  { %611 = vst [vmem:[#allocation6 + $0x230] sm:$0xff] %v355_v17  ;;  %612 = vst [vmem:[#allocation6 + $0x238] sm:$0xff] %v356_v18  ;;  %v361_v29 = vmul.f32 %v903_v0, %v103_v26  ;;  %v362_v30 = vmul.f32 %v903_v0, %v104_v27  ;;  %v105_v31 = vld [vmem:[#allocation3 + $0x270] sm:$0xff]  ;;  %v106_v32 = vld [vmem:[#allocation3 + $0x278] sm:$0xff] }
  0x3a   :  { %v107_v33 = vld [vmem:[#allocation3 + $0x280] sm:$0xff]  ;;  %613 = vst [vmem:[#allocation6 + $0x240] sm:$0xff] %v357_v22  ;;  %614 = vst [vmem:[#allocation6 + $0x248] sm:$0xff] %v358_v23  ;;  %v363_v34 = vmul.f32 %v903_v0, %v105_v31  ;;  %v364_v35 = vmul.f32 %v903_v0, %v106_v32  ;;  %v108_v37 = vld [vmem:[#allocation3 + $0x288] sm:$0xff] }
  0x3b   :  { %615 = vst [vmem:[#allocation6 + $0x250] sm:$0xff] %v359_v24  ;;  %v365_v36 = vmul.f32 %v903_v0, %v107_v33  ;;  %v109_v38 = vld [vmem:[#allocation3 + $0x290] sm:$0xff]  ;;  %v110_v39 = vld [vmem:[#allocation3 + $0x298] sm:$0xff]  ;;  %616 = vst [vmem:[#allocation6 + $0x258] sm:$0xff] %v360_v28  ;;  %v366_v40 = vmul.f32 %v903_v0, %v108_v37 }
  0x3c   :  { %617 = vst [vmem:[#allocation6 + $0x260] sm:$0xff] %v361_v29  ;;  %618 = vst [vmem:[#allocation6 + $0x268] sm:$0xff] %v362_v30  ;;  %v367_v41 = vmul.f32 %v903_v0, %v109_v38  ;;  %v368_v42 = vmul.f32 %v903_v0, %v110_v39  ;;  %v111_v43 = vld [vmem:[#allocation3 + $0x2a0] sm:$0xff]  ;;  %v112_v44 = vld [vmem:[#allocation3 + $0x2a8] sm:$0xff] }
  0x3d   :  { %v113_v45 = vld [vmem:[#allocation3 + $0x2b0] sm:$0xff]  ;;  %619 = vst [vmem:[#allocation6 + $0x270] sm:$0xff] %v363_v34  ;;  %620 = vst [vmem:[#allocation6 + $0x278] sm:$0xff] %v364_v35  ;;  %v369_v46 = vmul.f32 %v903_v0, %v111_v43  ;;  %v370_v47 = vmul.f32 %v903_v0, %v112_v44  ;;  %v114_v49 = vld [vmem:[#allocation3 + $0x2b8] sm:$0xff] }
  0x3e   :  { %621 = vst [vmem:[#allocation6 + $0x280] sm:$0xff] %v365_v36  ;;  %v371_v48 = vmul.f32 %v903_v0, %v113_v45  ;;  %v115_v50 = vld [vmem:[#allocation3 + $0x2c0] sm:$0xff]  ;;  %v116_v51 = vld [vmem:[#allocation3 + $0x2c8] sm:$0xff]  ;;  %622 = vst [vmem:[#allocation6 + $0x288] sm:$0xff] %v366_v40  ;;  %v372_v52 = vmul.f32 %v903_v0, %v114_v49 }
  0x3f   :  { %623 = vst [vmem:[#allocation6 + $0x290] sm:$0xff] %v367_v41  ;;  %624 = vst [vmem:[#allocation6 + $0x298] sm:$0xff] %v368_v42  ;;  %v373_v53 = vmul.f32 %v903_v0, %v115_v50  ;;  %v374_v54 = vmul.f32 %v903_v0, %v116_v51  ;;  %v117_v55 = vld [vmem:[#allocation3 + $0x2d0] sm:$0xff]  ;;  %v118_v56 = vld [vmem:[#allocation3 + $0x2d8] sm:$0xff] }
  0x40   :  { %v119_v57 = vld [vmem:[#allocation3 + $0x2e0] sm:$0xff]  ;;  %625 = vst [vmem:[#allocation6 + $0x2a0] sm:$0xff] %v369_v46  ;;  %626 = vst [vmem:[#allocation6 + $0x2a8] sm:$0xff] %v370_v47  ;;  %v375_v58 = vmul.f32 %v903_v0, %v117_v55  ;;  %v376_v59 = vmul.f32 %v903_v0, %v118_v56  ;;  %v120_v61 = vld [vmem:[#allocation3 + $0x2e8] sm:$0xff] }
  0x41   :  { %627 = vst [vmem:[#allocation6 + $0x2b0] sm:$0xff] %v371_v48  ;;  %v377_v60 = vmul.f32 %v903_v0, %v119_v57  ;;  %v121_v62 = vld [vmem:[#allocation3 + $0x2f0] sm:$0xff]  ;;  %v122_v63 = vld [vmem:[#allocation3 + $0x2f8] sm:$0xff]  ;;  %628 = vst [vmem:[#allocation6 + $0x2b8] sm:$0xff] %v372_v52  ;;  %v378_v1 = vmul.f32 %v903_v0, %v120_v61 }
  0x42   :  { %629 = vst [vmem:[#allocation6 + $0x2c0] sm:$0xff] %v373_v53  ;;  %630 = vst [vmem:[#allocation6 + $0x2c8] sm:$0xff] %v374_v54  ;;  %v379_v2 = vmul.f32 %v903_v0, %v121_v62  ;;  %v380_v3 = vmul.f32 %v903_v0, %v122_v63  ;;  %v123_v4 = vld [vmem:[#allocation3 + $0x300] sm:$0xff]  ;;  %v124_v5 = vld [vmem:[#allocation3 + $0x308] sm:$0xff] }
  0x43   :  { %v125_v6 = vld [vmem:[#allocation3 + $0x310] sm:$0xff]  ;;  %631 = vst [vmem:[#allocation6 + $0x2d0] sm:$0xff] %v375_v58  ;;  %632 = vst [vmem:[#allocation6 + $0x2d8] sm:$0xff] %v376_v59  ;;  %v381_v7 = vmul.f32 %v903_v0, %v123_v4  ;;  %v382_v8 = vmul.f32 %v903_v0, %v124_v5  ;;  %v126_v10 = vld [vmem:[#allocation3 + $0x318] sm:$0xff] }
  0x44   :  { %633 = vst [vmem:[#allocation6 + $0x2e0] sm:$0xff] %v377_v60  ;;  %v383_v9 = vmul.f32 %v903_v0, %v125_v6  ;;  %v127_v11 = vld [vmem:[#allocation3 + $0x320] sm:$0xff]  ;;  %v128_v12 = vld [vmem:[#allocation3 + $0x328] sm:$0xff]  ;;  %634 = vst [vmem:[#allocation6 + $0x2e8] sm:$0xff] %v378_v1  ;;  %v384_v13 = vmul.f32 %v903_v0, %v126_v10 }
  0x45   :  { %635 = vst [vmem:[#allocation6 + $0x2f0] sm:$0xff] %v379_v2  ;;  %636 = vst [vmem:[#allocation6 + $0x2f8] sm:$0xff] %v380_v3  ;;  %v385_v14 = vmul.f32 %v903_v0, %v127_v11  ;;  %v386_v15 = vmul.f32 %v903_v0, %v128_v12  ;;  %v129_v16 = vld [vmem:[#allocation3 + $0x330] sm:$0xff]  ;;  %v130_v17 = vld [vmem:[#allocation3 + $0x338] sm:$0xff] }
  0x46   :  { %v131_v18 = vld [vmem:[#allocation3 + $0x340] sm:$0xff]  ;;  %637 = vst [vmem:[#allocation6 + $0x300] sm:$0xff] %v381_v7  ;;  %638 = vst [vmem:[#allocation6 + $0x308] sm:$0xff] %v382_v8  ;;  %v387_v19 = vmul.f32 %v903_v0, %v129_v16  ;;  %v388_v20 = vmul.f32 %v903_v0, %v130_v17  ;;  %v132_v22 = vld [vmem:[#allocation3 + $0x348] sm:$0xff] }
  0x47   :  { %639 = vst [vmem:[#allocation6 + $0x310] sm:$0xff] %v383_v9  ;;  %v389_v21 = vmul.f32 %v903_v0, %v131_v18  ;;  %v133_v23 = vld [vmem:[#allocation3 + $0x350] sm:$0xff]  ;;  %v134_v24 = vld [vmem:[#allocation3 + $0x358] sm:$0xff]  ;;  %640 = vst [vmem:[#allocation6 + $0x318] sm:$0xff] %v384_v13  ;;  %v390_v25 = vmul.f32 %v903_v0, %v132_v22 }
  0x48   :  { %641 = vst [vmem:[#allocation6 + $0x320] sm:$0xff] %v385_v14  ;;  %642 = vst [vmem:[#allocation6 + $0x328] sm:$0xff] %v386_v15  ;;  %v391_v26 = vmul.f32 %v903_v0, %v133_v23  ;;  %v392_v27 = vmul.f32 %v903_v0, %v134_v24  ;;  %v135_v28 = vld [vmem:[#allocation3 + $0x360] sm:$0xff]  ;;  %v136_v29 = vld [vmem:[#allocation3 + $0x368] sm:$0xff] }
  0x49   :  { %v137_v30 = vld [vmem:[#allocation3 + $0x370] sm:$0xff]  ;;  %643 = vst [vmem:[#allocation6 + $0x330] sm:$0xff] %v387_v19  ;;  %644 = vst [vmem:[#allocation6 + $0x338] sm:$0xff] %v388_v20  ;;  %v393_v31 = vmul.f32 %v903_v0, %v135_v28  ;;  %v394_v32 = vmul.f32 %v903_v0, %v136_v29  ;;  %v138_v34 = vld [vmem:[#allocation3 + $0x378] sm:$0xff] }
  0x4a   :  { %645 = vst [vmem:[#allocation6 + $0x340] sm:$0xff] %v389_v21  ;;  %v395_v33 = vmul.f32 %v903_v0, %v137_v30  ;;  %v139_v35 = vld [vmem:[#allocation3 + $0x380] sm:$0xff]  ;;  %v140_v36 = vld [vmem:[#allocation3 + $0x388] sm:$0xff]  ;;  %646 = vst [vmem:[#allocation6 + $0x348] sm:$0xff] %v390_v25  ;;  %v396_v37 = vmul.f32 %v903_v0, %v138_v34 }
  0x4b   :  { %647 = vst [vmem:[#allocation6 + $0x350] sm:$0xff] %v391_v26  ;;  %648 = vst [vmem:[#allocation6 + $0x358] sm:$0xff] %v392_v27  ;;  %v397_v38 = vmul.f32 %v903_v0, %v139_v35  ;;  %v398_v39 = vmul.f32 %v903_v0, %v140_v36  ;;  %v141_v40 = vld [vmem:[#allocation3 + $0x390] sm:$0xff]  ;;  %v142_v41 = vld [vmem:[#allocation3 + $0x398] sm:$0xff] }
  0x4c   :  { %v143_v42 = vld [vmem:[#allocation3 + $0x3a0] sm:$0xff]  ;;  %649 = vst [vmem:[#allocation6 + $0x360] sm:$0xff] %v393_v31  ;;  %650 = vst [vmem:[#allocation6 + $0x368] sm:$0xff] %v394_v32  ;;  %v399_v43 = vmul.f32 %v903_v0, %v141_v40  ;;  %v400_v44 = vmul.f32 %v903_v0, %v142_v41  ;;  %v144_v46 = vld [vmem:[#allocation3 + $0x3a8] sm:$0xff] }
  0x4d   :  { %651 = vst [vmem:[#allocation6 + $0x370] sm:$0xff] %v395_v33  ;;  %v401_v45 = vmul.f32 %v903_v0, %v143_v42  ;;  %v145_v47 = vld [vmem:[#allocation3 + $0x3b0] sm:$0xff]  ;;  %v146_v48 = vld [vmem:[#allocation3 + $0x3b8] sm:$0xff]  ;;  %652 = vst [vmem:[#allocation6 + $0x378] sm:$0xff] %v396_v37  ;;  %v402_v49 = vmul.f32 %v903_v0, %v144_v46 }
  0x4e   :  { %653 = vst [vmem:[#allocation6 + $0x380] sm:$0xff] %v397_v38  ;;  %654 = vst [vmem:[#allocation6 + $0x388] sm:$0xff] %v398_v39  ;;  %v403_v50 = vmul.f32 %v903_v0, %v145_v47  ;;  %v404_v51 = vmul.f32 %v903_v0, %v146_v48  ;;  %v147_v52 = vld [vmem:[#allocation3 + $0x3c0] sm:$0xff]  ;;  %v148_v53 = vld [vmem:[#allocation3 + $0x3c8] sm:$0xff] }
  0x4f   :  { %v149_v54 = vld [vmem:[#allocation3 + $0x3d0] sm:$0xff]  ;;  %655 = vst [vmem:[#allocation6 + $0x390] sm:$0xff] %v399_v43  ;;  %656 = vst [vmem:[#allocation6 + $0x398] sm:$0xff] %v400_v44  ;;  %v405_v55 = vmul.f32 %v903_v0, %v147_v52  ;;  %v406_v56 = vmul.f32 %v903_v0, %v148_v53  ;;  %v150_v58 = vld [vmem:[#allocation3 + $0x3d8] sm:$0xff] }
  0x50   :  { %657 = vst [vmem:[#allocation6 + $0x3a0] sm:$0xff] %v401_v45  ;;  %v407_v57 = vmul.f32 %v903_v0, %v149_v54  ;;  %v151_v59 = vld [vmem:[#allocation3 + $0x3e0] sm:$0xff]  ;;  %v152_v60 = vld [vmem:[#allocation3 + $0x3e8] sm:$0xff]  ;;  %658 = vst [vmem:[#allocation6 + $0x3a8] sm:$0xff] %v402_v49  ;;  %v408_v61 = vmul.f32 %v903_v0, %v150_v58 }
  0x51   :  { %659 = vst [vmem:[#allocation6 + $0x3b0] sm:$0xff] %v403_v50  ;;  %660 = vst [vmem:[#allocation6 + $0x3b8] sm:$0xff] %v404_v51  ;;  %v409_v62 = vmul.f32 %v903_v0, %v151_v59  ;;  %v410_v63 = vmul.f32 %v903_v0, %v152_v60  ;;  %v153_v1 = vld [vmem:[#allocation3 + $0x3f0] sm:$0xff]  ;;  %v154_v2 = vld [vmem:[#allocation3 + $0x3f8] sm:$0xff] }
  0x52   :  { %v155_v3 = vld [vmem:[#allocation3 + $0x400] sm:$0xff]  ;;  %661 = vst [vmem:[#allocation6 + $0x3c0] sm:$0xff] %v405_v55  ;;  %662 = vst [vmem:[#allocation6 + $0x3c8] sm:$0xff] %v406_v56  ;;  %v411_v4 = vmul.f32 %v903_v0, %v153_v1  ;;  %v412_v5 = vmul.f32 %v903_v0, %v154_v2  ;;  %v156_v7 = vld [vmem:[#allocation3 + $0x408] sm:$0xff] }
  0x53   :  { %663 = vst [vmem:[#allocation6 + $0x3d0] sm:$0xff] %v407_v57  ;;  %v413_v6 = vmul.f32 %v903_v0, %v155_v3  ;;  %v157_v8 = vld [vmem:[#allocation3 + $0x410] sm:$0xff]  ;;  %v158_v9 = vld [vmem:[#allocation3 + $0x418] sm:$0xff]  ;;  %664 = vst [vmem:[#allocation6 + $0x3d8] sm:$0xff] %v408_v61  ;;  %v414_v10 = vmul.f32 %v903_v0, %v156_v7 }
  0x54   :  { %665 = vst [vmem:[#allocation6 + $0x3e0] sm:$0xff] %v409_v62  ;;  %666 = vst [vmem:[#allocation6 + $0x3e8] sm:$0xff] %v410_v63  ;;  %v415_v11 = vmul.f32 %v903_v0, %v157_v8  ;;  %v416_v12 = vmul.f32 %v903_v0, %v158_v9  ;;  %v159_v13 = vld [vmem:[#allocation3 + $0x420] sm:$0xff]  ;;  %v160_v14 = vld [vmem:[#allocation3 + $0x428] sm:$0xff] }
  0x55   :  { %v161_v15 = vld [vmem:[#allocation3 + $0x430] sm:$0xff]  ;;  %667 = vst [vmem:[#allocation6 + $0x3f0] sm:$0xff] %v411_v4  ;;  %668 = vst [vmem:[#allocation6 + $0x3f8] sm:$0xff] %v412_v5  ;;  %v417_v16 = vmul.f32 %v903_v0, %v159_v13  ;;  %v418_v17 = vmul.f32 %v903_v0, %v160_v14  ;;  %v162_v19 = vld [vmem:[#allocation3 + $0x438] sm:$0xff] }
  0x56   :  { %669 = vst [vmem:[#allocation6 + $0x400] sm:$0xff] %v413_v6  ;;  %v419_v18 = vmul.f32 %v903_v0, %v161_v15  ;;  %v163_v20 = vld [vmem:[#allocation3 + $0x440] sm:$0xff]  ;;  %v164_v21 = vld [vmem:[#allocation3 + $0x448] sm:$0xff]  ;;  %670 = vst [vmem:[#allocation6 + $0x408] sm:$0xff] %v414_v10  ;;  %v420_v22 = vmul.f32 %v903_v0, %v162_v19 }
  0x57   :  { %671 = vst [vmem:[#allocation6 + $0x410] sm:$0xff] %v415_v11  ;;  %672 = vst [vmem:[#allocation6 + $0x418] sm:$0xff] %v416_v12  ;;  %v421_v23 = vmul.f32 %v903_v0, %v163_v20  ;;  %v422_v24 = vmul.f32 %v903_v0, %v164_v21  ;;  %v165_v25 = vld [vmem:[#allocation3 + $0x450] sm:$0xff]  ;;  %v166_v26 = vld [vmem:[#allocation3 + $0x458] sm:$0xff] }
  0x58   :  { %v167_v27 = vld [vmem:[#allocation3 + $0x460] sm:$0xff]  ;;  %673 = vst [vmem:[#allocation6 + $0x420] sm:$0xff] %v417_v16  ;;  %674 = vst [vmem:[#allocation6 + $0x428] sm:$0xff] %v418_v17  ;;  %v423_v28 = vmul.f32 %v903_v0, %v165_v25  ;;  %v424_v29 = vmul.f32 %v903_v0, %v166_v26  ;;  %v168_v31 = vld [vmem:[#allocation3 + $0x468] sm:$0xff] }
  0x59   :  { %675 = vst [vmem:[#allocation6 + $0x430] sm:$0xff] %v419_v18  ;;  %v425_v30 = vmul.f32 %v903_v0, %v167_v27  ;;  %v169_v32 = vld [vmem:[#allocation3 + $0x470] sm:$0xff]  ;;  %v170_v33 = vld [vmem:[#allocation3 + $0x478] sm:$0xff]  ;;  %676 = vst [vmem:[#allocation6 + $0x438] sm:$0xff] %v420_v22  ;;  %v426_v34 = vmul.f32 %v903_v0, %v168_v31 }
  0x5a   :  { %677 = vst [vmem:[#allocation6 + $0x440] sm:$0xff] %v421_v23  ;;  %678 = vst [vmem:[#allocation6 + $0x448] sm:$0xff] %v422_v24  ;;  %v427_v35 = vmul.f32 %v903_v0, %v169_v32  ;;  %v428_v36 = vmul.f32 %v903_v0, %v170_v33  ;;  %v171_v37 = vld [vmem:[#allocation3 + $0x480] sm:$0xff]  ;;  %v172_v38 = vld [vmem:[#allocation3 + $0x488] sm:$0xff] }
  0x5b   :  { %v173_v39 = vld [vmem:[#allocation3 + $0x490] sm:$0xff]  ;;  %679 = vst [vmem:[#allocation6 + $0x450] sm:$0xff] %v423_v28  ;;  %680 = vst [vmem:[#allocation6 + $0x458] sm:$0xff] %v424_v29  ;;  %v429_v40 = vmul.f32 %v903_v0, %v171_v37  ;;  %v430_v41 = vmul.f32 %v903_v0, %v172_v38  ;;  %v174_v43 = vld [vmem:[#allocation3 + $0x498] sm:$0xff] }
  0x5c   :  { %681 = vst [vmem:[#allocation6 + $0x460] sm:$0xff] %v425_v30  ;;  %v431_v42 = vmul.f32 %v903_v0, %v173_v39  ;;  %v175_v44 = vld [vmem:[#allocation3 + $0x4a0] sm:$0xff]  ;;  %v176_v45 = vld [vmem:[#allocation3 + $0x4a8] sm:$0xff]  ;;  %682 = vst [vmem:[#allocation6 + $0x468] sm:$0xff] %v426_v34  ;;  %v432_v46 = vmul.f32 %v903_v0, %v174_v43 }
  0x5d   :  { %683 = vst [vmem:[#allocation6 + $0x470] sm:$0xff] %v427_v35  ;;  %684 = vst [vmem:[#allocation6 + $0x478] sm:$0xff] %v428_v36  ;;  %v433_v47 = vmul.f32 %v903_v0, %v175_v44  ;;  %v434_v48 = vmul.f32 %v903_v0, %v176_v45  ;;  %v177_v49 = vld [vmem:[#allocation3 + $0x4b0] sm:$0xff]  ;;  %v178_v50 = vld [vmem:[#allocation3 + $0x4b8] sm:$0xff] }
  0x5e   :  { %v179_v51 = vld [vmem:[#allocation3 + $0x4c0] sm:$0xff]  ;;  %685 = vst [vmem:[#allocation6 + $0x480] sm:$0xff] %v429_v40  ;;  %686 = vst [vmem:[#allocation6 + $0x488] sm:$0xff] %v430_v41  ;;  %v435_v52 = vmul.f32 %v903_v0, %v177_v49  ;;  %v436_v53 = vmul.f32 %v903_v0, %v178_v50  ;;  %v180_v55 = vld [vmem:[#allocation3 + $0x4c8] sm:$0xff] }
  0x5f   :  { %687 = vst [vmem:[#allocation6 + $0x490] sm:$0xff] %v431_v42  ;;  %v437_v54 = vmul.f32 %v903_v0, %v179_v51  ;;  %v181_v56 = vld [vmem:[#allocation3 + $0x4d0] sm:$0xff]  ;;  %v182_v57 = vld [vmem:[#allocation3 + $0x4d8] sm:$0xff]  ;;  %688 = vst [vmem:[#allocation6 + $0x498] sm:$0xff] %v432_v46  ;;  %v438_v58 = vmul.f32 %v903_v0, %v180_v55 }
  0x60   :  { %689 = vst [vmem:[#allocation6 + $0x4a0] sm:$0xff] %v433_v47  ;;  %690 = vst [vmem:[#allocation6 + $0x4a8] sm:$0xff] %v434_v48  ;;  %v439_v59 = vmul.f32 %v903_v0, %v181_v56  ;;  %v440_v60 = vmul.f32 %v903_v0, %v182_v57  ;;  %v183_v61 = vld [vmem:[#allocation3 + $0x4e0] sm:$0xff]  ;;  %v184_v62 = vld [vmem:[#allocation3 + $0x4e8] sm:$0xff] }
  0x61   :  { %v185_v63 = vld [vmem:[#allocation3 + $0x4f0] sm:$0xff]  ;;  %691 = vst [vmem:[#allocation6 + $0x4b0] sm:$0xff] %v435_v52  ;;  %692 = vst [vmem:[#allocation6 + $0x4b8] sm:$0xff] %v436_v53  ;;  %v441_v1 = vmul.f32 %v903_v0, %v183_v61  ;;  %v442_v2 = vmul.f32 %v903_v0, %v184_v62  ;;  %v186_v4 = vld [vmem:[#allocation3 + $0x4f8] sm:$0xff] }
  0x62   :  { %693 = vst [vmem:[#allocation6 + $0x4c0] sm:$0xff] %v437_v54  ;;  %v443_v3 = vmul.f32 %v903_v0, %v185_v63  ;;  %v187_v5 = vld [vmem:[#allocation3 + $0x500] sm:$0xff]  ;;  %v188_v6 = vld [vmem:[#allocation3 + $0x508] sm:$0xff]  ;;  %694 = vst [vmem:[#allocation6 + $0x4c8] sm:$0xff] %v438_v58  ;;  %v444_v7 = vmul.f32 %v903_v0, %v186_v4 }
  0x63   :  { %695 = vst [vmem:[#allocation6 + $0x4d0] sm:$0xff] %v439_v59  ;;  %696 = vst [vmem:[#allocation6 + $0x4d8] sm:$0xff] %v440_v60  ;;  %v445_v8 = vmul.f32 %v903_v0, %v187_v5  ;;  %v446_v9 = vmul.f32 %v903_v0, %v188_v6  ;;  %v189_v10 = vld [vmem:[#allocation3 + $0x510] sm:$0xff]  ;;  %v190_v11 = vld [vmem:[#allocation3 + $0x518] sm:$0xff] }
  0x64   :  { %v191_v12 = vld [vmem:[#allocation3 + $0x520] sm:$0xff]  ;;  %697 = vst [vmem:[#allocation6 + $0x4e0] sm:$0xff] %v441_v1  ;;  %698 = vst [vmem:[#allocation6 + $0x4e8] sm:$0xff] %v442_v2  ;;  %v447_v13 = vmul.f32 %v903_v0, %v189_v10  ;;  %v448_v14 = vmul.f32 %v903_v0, %v190_v11  ;;  %v192_v16 = vld [vmem:[#allocation3 + $0x528] sm:$0xff] }
  0x65   :  { %699 = vst [vmem:[#allocation6 + $0x4f0] sm:$0xff] %v443_v3  ;;  %v449_v15 = vmul.f32 %v903_v0, %v191_v12  ;;  %v193_v17 = vld [vmem:[#allocation3 + $0x530] sm:$0xff]  ;;  %v194_v18 = vld [vmem:[#allocation3 + $0x538] sm:$0xff]  ;;  %700 = vst [vmem:[#allocation6 + $0x4f8] sm:$0xff] %v444_v7  ;;  %v450_v19 = vmul.f32 %v903_v0, %v192_v16 }
  0x66   :  { %701 = vst [vmem:[#allocation6 + $0x500] sm:$0xff] %v445_v8  ;;  %702 = vst [vmem:[#allocation6 + $0x508] sm:$0xff] %v446_v9  ;;  %v451_v20 = vmul.f32 %v903_v0, %v193_v17  ;;  %v452_v21 = vmul.f32 %v903_v0, %v194_v18  ;;  %v195_v22 = vld [vmem:[#allocation3 + $0x540] sm:$0xff]  ;;  %v196_v23 = vld [vmem:[#allocation3 + $0x548] sm:$0xff] }
  0x67   :  { %v197_v24 = vld [vmem:[#allocation3 + $0x550] sm:$0xff]  ;;  %703 = vst [vmem:[#allocation6 + $0x510] sm:$0xff] %v447_v13  ;;  %704 = vst [vmem:[#allocation6 + $0x518] sm:$0xff] %v448_v14  ;;  %v453_v25 = vmul.f32 %v903_v0, %v195_v22  ;;  %v454_v26 = vmul.f32 %v903_v0, %v196_v23  ;;  %v198_v28 = vld [vmem:[#allocation3 + $0x558] sm:$0xff] }
  0x68   :  { %705 = vst [vmem:[#allocation6 + $0x520] sm:$0xff] %v449_v15  ;;  %v455_v27 = vmul.f32 %v903_v0, %v197_v24  ;;  %v199_v29 = vld [vmem:[#allocation3 + $0x560] sm:$0xff]  ;;  %v200_v30 = vld [vmem:[#allocation3 + $0x568] sm:$0xff]  ;;  %706 = vst [vmem:[#allocation6 + $0x528] sm:$0xff] %v450_v19  ;;  %v456_v31 = vmul.f32 %v903_v0, %v198_v28 }
  0x69   :  { %707 = vst [vmem:[#allocation6 + $0x530] sm:$0xff] %v451_v20  ;;  %708 = vst [vmem:[#allocation6 + $0x538] sm:$0xff] %v452_v21  ;;  %v457_v32 = vmul.f32 %v903_v0, %v199_v29  ;;  %v458_v33 = vmul.f32 %v903_v0, %v200_v30  ;;  %v201_v34 = vld [vmem:[#allocation3 + $0x570] sm:$0xff]  ;;  %v202_v35 = vld [vmem:[#allocation3 + $0x578] sm:$0xff] }
  0x6a   :  { %v203_v36 = vld [vmem:[#allocation3 + $0x580] sm:$0xff]  ;;  %709 = vst [vmem:[#allocation6 + $0x540] sm:$0xff] %v453_v25  ;;  %710 = vst [vmem:[#allocation6 + $0x548] sm:$0xff] %v454_v26  ;;  %v459_v37 = vmul.f32 %v903_v0, %v201_v34  ;;  %v460_v38 = vmul.f32 %v903_v0, %v202_v35  ;;  %v204_v40 = vld [vmem:[#allocation3 + $0x588] sm:$0xff] }
  0x6b   :  { %711 = vst [vmem:[#allocation6 + $0x550] sm:$0xff] %v455_v27  ;;  %v461_v39 = vmul.f32 %v903_v0, %v203_v36  ;;  %v205_v41 = vld [vmem:[#allocation3 + $0x590] sm:$0xff]  ;;  %v206_v42 = vld [vmem:[#allocation3 + $0x598] sm:$0xff]  ;;  %712 = vst [vmem:[#allocation6 + $0x558] sm:$0xff] %v456_v31  ;;  %v462_v43 = vmul.f32 %v903_v0, %v204_v40 }
  0x6c   :  { %713 = vst [vmem:[#allocation6 + $0x560] sm:$0xff] %v457_v32  ;;  %714 = vst [vmem:[#allocation6 + $0x568] sm:$0xff] %v458_v33  ;;  %v463_v44 = vmul.f32 %v903_v0, %v205_v41  ;;  %v464_v45 = vmul.f32 %v903_v0, %v206_v42  ;;  %v207_v46 = vld [vmem:[#allocation3 + $0x5a0] sm:$0xff]  ;;  %v208_v47 = vld [vmem:[#allocation3 + $0x5a8] sm:$0xff] }
  0x6d   :  { %v209_v48 = vld [vmem:[#allocation3 + $0x5b0] sm:$0xff]  ;;  %715 = vst [vmem:[#allocation6 + $0x570] sm:$0xff] %v459_v37  ;;  %716 = vst [vmem:[#allocation6 + $0x578] sm:$0xff] %v460_v38  ;;  %v465_v49 = vmul.f32 %v903_v0, %v207_v46  ;;  %v466_v50 = vmul.f32 %v903_v0, %v208_v47  ;;  %v210_v52 = vld [vmem:[#allocation3 + $0x5b8] sm:$0xff] }
  0x6e   :  { %717 = vst [vmem:[#allocation6 + $0x580] sm:$0xff] %v461_v39  ;;  %v467_v51 = vmul.f32 %v903_v0, %v209_v48  ;;  %v211_v53 = vld [vmem:[#allocation3 + $0x5c0] sm:$0xff]  ;;  %v212_v54 = vld [vmem:[#allocation3 + $0x5c8] sm:$0xff]  ;;  %718 = vst [vmem:[#allocation6 + $0x588] sm:$0xff] %v462_v43  ;;  %v468_v55 = vmul.f32 %v903_v0, %v210_v52 }
  0x6f   :  { %719 = vst [vmem:[#allocation6 + $0x590] sm:$0xff] %v463_v44  ;;  %720 = vst [vmem:[#allocation6 + $0x598] sm:$0xff] %v464_v45  ;;  %v469_v56 = vmul.f32 %v903_v0, %v211_v53  ;;  %v470_v57 = vmul.f32 %v903_v0, %v212_v54  ;;  %v213_v58 = vld [vmem:[#allocation3 + $0x5d0] sm:$0xff]  ;;  %v214_v59 = vld [vmem:[#allocation3 + $0x5d8] sm:$0xff] }
  0x70   :  { %v215_v60 = vld [vmem:[#allocation3 + $0x5e0] sm:$0xff]  ;;  %721 = vst [vmem:[#allocation6 + $0x5a0] sm:$0xff] %v465_v49  ;;  %722 = vst [vmem:[#allocation6 + $0x5a8] sm:$0xff] %v466_v50  ;;  %v471_v61 = vmul.f32 %v903_v0, %v213_v58  ;;  %v472_v62 = vmul.f32 %v903_v0, %v214_v59  ;;  %v216_v1 = vld [vmem:[#allocation3 + $0x5e8] sm:$0xff] }
  0x71   :  { %723 = vst [vmem:[#allocation6 + $0x5b0] sm:$0xff] %v467_v51  ;;  %v473_v63 = vmul.f32 %v903_v0, %v215_v60  ;;  %v217_v2 = vld [vmem:[#allocation3 + $0x5f0] sm:$0xff]  ;;  %v218_v3 = vld [vmem:[#allocation3 + $0x5f8] sm:$0xff]  ;;  %724 = vst [vmem:[#allocation6 + $0x5b8] sm:$0xff] %v468_v55  ;;  %v474_v4 = vmul.f32 %v903_v0, %v216_v1 }
  0x72   :  { %725 = vst [vmem:[#allocation6 + $0x5c0] sm:$0xff] %v469_v56  ;;  %726 = vst [vmem:[#allocation6 + $0x5c8] sm:$0xff] %v470_v57  ;;  %v475_v5 = vmul.f32 %v903_v0, %v217_v2  ;;  %v476_v6 = vmul.f32 %v903_v0, %v218_v3  ;;  %v219_v7 = vld [vmem:[#allocation3 + $0x600] sm:$0xff]  ;;  %v220_v8 = vld [vmem:[#allocation3 + $0x608] sm:$0xff] }
  0x73   :  { %v221_v9 = vld [vmem:[#allocation3 + $0x610] sm:$0xff]  ;;  %727 = vst [vmem:[#allocation6 + $0x5d0] sm:$0xff] %v471_v61  ;;  %728 = vst [vmem:[#allocation6 + $0x5d8] sm:$0xff] %v472_v62  ;;  %v477_v10 = vmul.f32 %v903_v0, %v219_v7  ;;  %v478_v11 = vmul.f32 %v903_v0, %v220_v8  ;;  %v222_v13 = vld [vmem:[#allocation3 + $0x618] sm:$0xff] }
  0x74   :  { %729 = vst [vmem:[#allocation6 + $0x5e0] sm:$0xff] %v473_v63  ;;  %v479_v12 = vmul.f32 %v903_v0, %v221_v9  ;;  %v223_v14 = vld [vmem:[#allocation3 + $0x620] sm:$0xff]  ;;  %v224_v15 = vld [vmem:[#allocation3 + $0x628] sm:$0xff]  ;;  %730 = vst [vmem:[#allocation6 + $0x5e8] sm:$0xff] %v474_v4  ;;  %v480_v16 = vmul.f32 %v903_v0, %v222_v13 }
  0x75   :  { %731 = vst [vmem:[#allocation6 + $0x5f0] sm:$0xff] %v475_v5  ;;  %732 = vst [vmem:[#allocation6 + $0x5f8] sm:$0xff] %v476_v6  ;;  %v481_v17 = vmul.f32 %v903_v0, %v223_v14  ;;  %v482_v18 = vmul.f32 %v903_v0, %v224_v15  ;;  %v225_v19 = vld [vmem:[#allocation3 + $0x630] sm:$0xff]  ;;  %v226_v20 = vld [vmem:[#allocation3 + $0x638] sm:$0xff] }
  0x76   :  { %v227_v21 = vld [vmem:[#allocation3 + $0x640] sm:$0xff]  ;;  %733 = vst [vmem:[#allocation6 + $0x600] sm:$0xff] %v477_v10  ;;  %734 = vst [vmem:[#allocation6 + $0x608] sm:$0xff] %v478_v11  ;;  %v483_v22 = vmul.f32 %v903_v0, %v225_v19  ;;  %v484_v23 = vmul.f32 %v903_v0, %v226_v20  ;;  %v228_v25 = vld [vmem:[#allocation3 + $0x648] sm:$0xff] }
  0x77   :  { %735 = vst [vmem:[#allocation6 + $0x610] sm:$0xff] %v479_v12  ;;  %v485_v24 = vmul.f32 %v903_v0, %v227_v21  ;;  %v229_v26 = vld [vmem:[#allocation3 + $0x650] sm:$0xff]  ;;  %v230_v27 = vld [vmem:[#allocation3 + $0x658] sm:$0xff]  ;;  %736 = vst [vmem:[#allocation6 + $0x618] sm:$0xff] %v480_v16  ;;  %v486_v28 = vmul.f32 %v903_v0, %v228_v25 }
  0x78   :  { %737 = vst [vmem:[#allocation6 + $0x620] sm:$0xff] %v481_v17  ;;  %738 = vst [vmem:[#allocation6 + $0x628] sm:$0xff] %v482_v18  ;;  %v487_v29 = vmul.f32 %v903_v0, %v229_v26  ;;  %v488_v30 = vmul.f32 %v903_v0, %v230_v27  ;;  %v231_v31 = vld [vmem:[#allocation3 + $0x660] sm:$0xff]  ;;  %v232_v32 = vld [vmem:[#allocation3 + $0x668] sm:$0xff] }
  0x79   :  { %v233_v33 = vld [vmem:[#allocation3 + $0x670] sm:$0xff]  ;;  %739 = vst [vmem:[#allocation6 + $0x630] sm:$0xff] %v483_v22  ;;  %740 = vst [vmem:[#allocation6 + $0x638] sm:$0xff] %v484_v23  ;;  %v489_v34 = vmul.f32 %v903_v0, %v231_v31  ;;  %v490_v35 = vmul.f32 %v903_v0, %v232_v32  ;;  %v234_v37 = vld [vmem:[#allocation3 + $0x678] sm:$0xff] }
  0x7a   :  { %741 = vst [vmem:[#allocation6 + $0x640] sm:$0xff] %v485_v24  ;;  %v491_v36 = vmul.f32 %v903_v0, %v233_v33  ;;  %v235_v38 = vld [vmem:[#allocation3 + $0x680] sm:$0xff]  ;;  %v236_v39 = vld [vmem:[#allocation3 + $0x688] sm:$0xff]  ;;  %742 = vst [vmem:[#allocation6 + $0x648] sm:$0xff] %v486_v28  ;;  %v492_v40 = vmul.f32 %v903_v0, %v234_v37 }
  0x7b   :  { %743 = vst [vmem:[#allocation6 + $0x650] sm:$0xff] %v487_v29  ;;  %744 = vst [vmem:[#allocation6 + $0x658] sm:$0xff] %v488_v30  ;;  %v493_v41 = vmul.f32 %v903_v0, %v235_v38  ;;  %v494_v42 = vmul.f32 %v903_v0, %v236_v39  ;;  %v237_v43 = vld [vmem:[#allocation3 + $0x690] sm:$0xff]  ;;  %v238_v44 = vld [vmem:[#allocation3 + $0x698] sm:$0xff] }
  0x7c   :  { %v239_v45 = vld [vmem:[#allocation3 + $0x6a0] sm:$0xff]  ;;  %745 = vst [vmem:[#allocation6 + $0x660] sm:$0xff] %v489_v34  ;;  %746 = vst [vmem:[#allocation6 + $0x668] sm:$0xff] %v490_v35  ;;  %v495_v46 = vmul.f32 %v903_v0, %v237_v43  ;;  %v496_v47 = vmul.f32 %v903_v0, %v238_v44  ;;  %v240_v49 = vld [vmem:[#allocation3 + $0x6a8] sm:$0xff] }
  0x7d   :  { %747 = vst [vmem:[#allocation6 + $0x670] sm:$0xff] %v491_v36  ;;  %v497_v48 = vmul.f32 %v903_v0, %v239_v45  ;;  %v241_v50 = vld [vmem:[#allocation3 + $0x6b0] sm:$0xff]  ;;  %v242_v51 = vld [vmem:[#allocation3 + $0x6b8] sm:$0xff]  ;;  %748 = vst [vmem:[#allocation6 + $0x678] sm:$0xff] %v492_v40  ;;  %v498_v52 = vmul.f32 %v903_v0, %v240_v49 }
  0x7e   :  { %749 = vst [vmem:[#allocation6 + $0x680] sm:$0xff] %v493_v41  ;;  %750 = vst [vmem:[#allocation6 + $0x688] sm:$0xff] %v494_v42  ;;  %v499_v53 = vmul.f32 %v903_v0, %v241_v50  ;;  %v500_v54 = vmul.f32 %v903_v0, %v242_v51  ;;  %v243_v55 = vld [vmem:[#allocation3 + $0x6c0] sm:$0xff]  ;;  %v244_v56 = vld [vmem:[#allocation3 + $0x6c8] sm:$0xff] }
  0x7f   :  { %v245_v57 = vld [vmem:[#allocation3 + $0x6d0] sm:$0xff]  ;;  %751 = vst [vmem:[#allocation6 + $0x690] sm:$0xff] %v495_v46  ;;  %752 = vst [vmem:[#allocation6 + $0x698] sm:$0xff] %v496_v47  ;;  %v501_v58 = vmul.f32 %v903_v0, %v243_v55  ;;  %v502_v59 = vmul.f32 %v903_v0, %v244_v56  ;;  %v246_v61 = vld [vmem:[#allocation3 + $0x6d8] sm:$0xff] }
  0x80   :  { %753 = vst [vmem:[#allocation6 + $0x6a0] sm:$0xff] %v497_v48  ;;  %v503_v60 = vmul.f32 %v903_v0, %v245_v57  ;;  %v247_v62 = vld [vmem:[#allocation3 + $0x6e0] sm:$0xff]  ;;  %v248_v63 = vld [vmem:[#allocation3 + $0x6e8] sm:$0xff]  ;;  %754 = vst [vmem:[#allocation6 + $0x6a8] sm:$0xff] %v498_v52  ;;  %v504_v1 = vmul.f32 %v903_v0, %v246_v61 }
  0x81   :  { %755 = vst [vmem:[#allocation6 + $0x6b0] sm:$0xff] %v499_v53  ;;  %756 = vst [vmem:[#allocation6 + $0x6b8] sm:$0xff] %v500_v54  ;;  %v505_v2 = vmul.f32 %v903_v0, %v247_v62  ;;  %v506_v3 = vmul.f32 %v903_v0, %v248_v63  ;;  %v249_v4 = vld [vmem:[#allocation3 + $0x6f0] sm:$0xff]  ;;  %v250_v5 = vld [vmem:[#allocation3 + $0x6f8] sm:$0xff] }
  0x82   :  { %v251_v6 = vld [vmem:[#allocation3 + $0x700] sm:$0xff]  ;;  %757 = vst [vmem:[#allocation6 + $0x6c0] sm:$0xff] %v501_v58  ;;  %758 = vst [vmem:[#allocation6 + $0x6c8] sm:$0xff] %v502_v59  ;;  %v507_v7 = vmul.f32 %v903_v0, %v249_v4  ;;  %v508_v8 = vmul.f32 %v903_v0, %v250_v5  ;;  %v252_v10 = vld [vmem:[#allocation3 + $0x708] sm:$0xff] }
  0x83   :  { %759 = vst [vmem:[#allocation6 + $0x6d0] sm:$0xff] %v503_v60  ;;  %v509_v9 = vmul.f32 %v903_v0, %v251_v6  ;;  %v253_v11 = vld [vmem:[#allocation3 + $0x710] sm:$0xff]  ;;  %v254_v12 = vld [vmem:[#allocation3 + $0x718] sm:$0xff]  ;;  %760 = vst [vmem:[#allocation6 + $0x6d8] sm:$0xff] %v504_v1  ;;  %v510_v13 = vmul.f32 %v903_v0, %v252_v10 }
  0x84   :  { %761 = vst [vmem:[#allocation6 + $0x6e0] sm:$0xff] %v505_v2  ;;  %762 = vst [vmem:[#allocation6 + $0x6e8] sm:$0xff] %v506_v3  ;;  %v511_v14 = vmul.f32 %v903_v0, %v253_v11  ;;  %v512_v15 = vmul.f32 %v903_v0, %v254_v12  ;;  %v255_v16 = vld [vmem:[#allocation3 + $0x720] sm:$0xff]  ;;  %v256_v17 = vld [vmem:[#allocation3 + $0x728] sm:$0xff] }
  0x85   :  { %v257_v18 = vld [vmem:[#allocation3 + $0x730] sm:$0xff]  ;;  %763 = vst [vmem:[#allocation6 + $0x6f0] sm:$0xff] %v507_v7  ;;  %764 = vst [vmem:[#allocation6 + $0x6f8] sm:$0xff] %v508_v8  ;;  %v513_v19 = vmul.f32 %v903_v0, %v255_v16  ;;  %v514_v20 = vmul.f32 %v903_v0, %v256_v17  ;;  %v258_v22 = vld [vmem:[#allocation3 + $0x738] sm:$0xff] }
  0x86   :  { %765 = vst [vmem:[#allocation6 + $0x700] sm:$0xff] %v509_v9  ;;  %v515_v21 = vmul.f32 %v903_v0, %v257_v18  ;;  %v259_v23 = vld [vmem:[#allocation3 + $0x740] sm:$0xff]  ;;  %v260_v24 = vld [vmem:[#allocation3 + $0x748] sm:$0xff]  ;;  %766 = vst [vmem:[#allocation6 + $0x708] sm:$0xff] %v510_v13  ;;  %v516_v25 = vmul.f32 %v903_v0, %v258_v22 }
  0x87   :  { %767 = vst [vmem:[#allocation6 + $0x710] sm:$0xff] %v511_v14  ;;  %768 = vst [vmem:[#allocation6 + $0x718] sm:$0xff] %v512_v15  ;;  %v517_v26 = vmul.f32 %v903_v0, %v259_v23  ;;  %v518_v27 = vmul.f32 %v903_v0, %v260_v24  ;;  %v261_v28 = vld [vmem:[#allocation3 + $0x750] sm:$0xff]  ;;  %v262_v29 = vld [vmem:[#allocation3 + $0x758] sm:$0xff] }
  0x88   :  { %v263_v30 = vld [vmem:[#allocation3 + $0x760] sm:$0xff]  ;;  %769 = vst [vmem:[#allocation6 + $0x720] sm:$0xff] %v513_v19  ;;  %770 = vst [vmem:[#allocation6 + $0x728] sm:$0xff] %v514_v20  ;;  %v519_v31 = vmul.f32 %v903_v0, %v261_v28  ;;  %v520_v32 = vmul.f32 %v903_v0, %v262_v29  ;;  %v264_v34 = vld [vmem:[#allocation3 + $0x768] sm:$0xff] }
  0x89   :  { %771 = vst [vmem:[#allocation6 + $0x730] sm:$0xff] %v515_v21  ;;  %v521_v33 = vmul.f32 %v903_v0, %v263_v30  ;;  %v265_v35 = vld [vmem:[#allocation3 + $0x770] sm:$0xff]  ;;  %v266_v36 = vld [vmem:[#allocation3 + $0x778] sm:$0xff]  ;;  %772 = vst [vmem:[#allocation6 + $0x738] sm:$0xff] %v516_v25  ;;  %v522_v37 = vmul.f32 %v903_v0, %v264_v34 }
  0x8a   :  { %773 = vst [vmem:[#allocation6 + $0x740] sm:$0xff] %v517_v26  ;;  %774 = vst [vmem:[#allocation6 + $0x748] sm:$0xff] %v518_v27  ;;  %v523_v38 = vmul.f32 %v903_v0, %v265_v35  ;;  %v524_v39 = vmul.f32 %v903_v0, %v266_v36  ;;  %v267_v40 = vld [vmem:[#allocation3 + $0x780] sm:$0xff]  ;;  %v268_v41 = vld [vmem:[#allocation3 + $0x788] sm:$0xff] }
  0x8b   :  { %v269_v42 = vld [vmem:[#allocation3 + $0x790] sm:$0xff]  ;;  %775 = vst [vmem:[#allocation6 + $0x750] sm:$0xff] %v519_v31  ;;  %776 = vst [vmem:[#allocation6 + $0x758] sm:$0xff] %v520_v32  ;;  %v525_v43 = vmul.f32 %v903_v0, %v267_v40  ;;  %v526_v44 = vmul.f32 %v903_v0, %v268_v41  ;;  %v270_v46 = vld [vmem:[#allocation3 + $0x798] sm:$0xff] }
  0x8c   :  { %777 = vst [vmem:[#allocation6 + $0x760] sm:$0xff] %v521_v33  ;;  %v527_v45 = vmul.f32 %v903_v0, %v269_v42  ;;  %v271_v47 = vld [vmem:[#allocation3 + $0x7a0] sm:$0xff]  ;;  %v272_v48 = vld [vmem:[#allocation3 + $0x7a8] sm:$0xff]  ;;  %778 = vst [vmem:[#allocation6 + $0x768] sm:$0xff] %v522_v37  ;;  %v528_v49 = vmul.f32 %v903_v0, %v270_v46 }
  0x8d   :  { %779 = vst [vmem:[#allocation6 + $0x770] sm:$0xff] %v523_v38  ;;  %780 = vst [vmem:[#allocation6 + $0x778] sm:$0xff] %v524_v39  ;;  %v529_v50 = vmul.f32 %v903_v0, %v271_v47  ;;  %v530_v51 = vmul.f32 %v903_v0, %v272_v48  ;;  %v273_v52 = vld [vmem:[#allocation3 + $0x7b0] sm:$0xff]  ;;  %v274_v53 = vld [vmem:[#allocation3 + $0x7b8] sm:$0xff] }
  0x8e   :  { %v275_v54 = vld [vmem:[#allocation3 + $0x7c0] sm:$0xff]  ;;  %781 = vst [vmem:[#allocation6 + $0x780] sm:$0xff] %v525_v43  ;;  %782 = vst [vmem:[#allocation6 + $0x788] sm:$0xff] %v526_v44  ;;  %v531_v55 = vmul.f32 %v903_v0, %v273_v52  ;;  %v532_v56 = vmul.f32 %v903_v0, %v274_v53  ;;  %v276_v58 = vld [vmem:[#allocation3 + $0x7c8] sm:$0xff] }
  0x8f   :  { %783 = vst [vmem:[#allocation6 + $0x790] sm:$0xff] %v527_v45  ;;  %v533_v57 = vmul.f32 %v903_v0, %v275_v54  ;;  %v277_v59 = vld [vmem:[#allocation3 + $0x7d0] sm:$0xff]  ;;  %v278_v60 = vld [vmem:[#allocation3 + $0x7d8] sm:$0xff]  ;;  %784 = vst [vmem:[#allocation6 + $0x798] sm:$0xff] %v528_v49  ;;  %v534_v61 = vmul.f32 %v903_v0, %v276_v58 }
  0x90   :  { %785 = vst [vmem:[#allocation6 + $0x7a0] sm:$0xff] %v529_v50  ;;  %786 = vst [vmem:[#allocation6 + $0x7a8] sm:$0xff] %v530_v51  ;;  %v535_v62 = vmul.f32 %v903_v0, %v277_v59  ;;  %v536_v63 = vmul.f32 %v903_v0, %v278_v60  ;;  %v279_v1 = vld [vmem:[#allocation3 + $0x7e0] sm:$0xff]  ;;  %v280_v2 = vld [vmem:[#allocation3 + $0x7e8] sm:$0xff] }
  0x91   :  { %v281_v3 = vld [vmem:[#allocation3 + $0x7f0] sm:$0xff]  ;;  %787 = vst [vmem:[#allocation6 + $0x7b0] sm:$0xff] %v531_v55  ;;  %788 = vst [vmem:[#allocation6 + $0x7b8] sm:$0xff] %v532_v56  ;;  %v537_v4 = vmul.f32 %v903_v0, %v279_v1  ;;  %v538_v5 = vmul.f32 %v903_v0, %v280_v2  ;;  %v282_v7 = vld [vmem:[#allocation3 + $0x7f8] sm:$0xff] }
  0x92   :  { %789 = vst [vmem:[#allocation6 + $0x7c0] sm:$0xff] %v533_v57  ;;  %v539_v6 = vmul.f32 %v903_v0, %v281_v3  ;;  %790 = vst [vmem:[#allocation6 + $0x7c8] sm:$0xff] %v534_v61  ;;  %v540_v8 = vmul.f32 %v903_v0, %v282_v7 }
  0x93   :  { %791 = vst [vmem:[#allocation6 + $0x7d0] sm:$0xff] %v535_v62  ;;  %792 = vst [vmem:[#allocation6 + $0x7d8] sm:$0xff] %v536_v63 }
  0x94   :  { %793 = vst [vmem:[#allocation6 + $0x7e0] sm:$0xff] %v537_v4  ;;  %794 = vst [vmem:[#allocation6 + $0x7e8] sm:$0xff] %v538_v5 }
  0x95   :  { %795 = vst [vmem:[#allocation6 + $0x7f0] sm:$0xff] %v539_v6  ;;  %796 = vst [vmem:[#allocation6 + $0x7f8] sm:$0xff] %v540_v8 }
  0x96   :  { %851 = shalt.err (!%p848_p12)
}
  0x97   :  { %s852_s28 = scalar_lea.hbm %s1178_s2, 32768 }
  0x98   :  { %p853_p13 = scmp.ne.s32.totalorder %s1178_s2, %s852_s28  ;;  %p856_p0 = scmp.lt.u32.totalorder %s852_s28, %s1178_s2 }
  0x9a   :  { %p858_p1 = pnand %p856_p0, %p853_p13 }
  0x9c   :  { %861 = shalt.err (!%p858_p1)
}
  0x9d   :  { %808 = dma.vmem_to_hbm [thread:$0]  %s803_s1, 32768, %s1178_s2, [#allocation5], %s867_s19, %s867_s19, %s868_s20  }
  0x9e   :  { %864 = dma.done.wait [#allocation5], 32768  }
  0x9f   :  { %865 = vsyncadd [#allocation5], 4294934528 }
  0xa0   :  { %812 = vsyncpa [#allocation4], 1 }
  0xa1   :  { %813 = vsyncpa [#allocation5], 1 }

</bundles_post_ra>
